<compile_context>
chip_gen: v6e
topology: v6e:2x2x1
jax: 0.10.0
libtpu: 0.0.40
codegen_flags: <defaults>
</compile_context>

<pallas_src>
import jax
import jax.numpy as jnp
from jax.experimental import pallas as pl
from jax.experimental.pallas import tpu as pltpu

_LANE = 128
_SUBLANE = 32  # keep row tiles a multiple of 32 -> clean packed 8-bit mask stores


def _pick_tiling():
    """Return (row_tile_cap, force_two_tiles) for the local TPU generation."""
    try:
        kind = jax.devices()[0].device_kind.lower()
    except Exception:
        kind = ""
    if "v6" in kind:
        # ~23 MiB double-buffered working set fits the 32 MiB scoped-VMEM default.
        return 4096, False
    if "v7" in kind or "7x" in kind or "tpu7" in kind:
        # Same budget, but also keep >=2 grid steps so both TensorCores get work.
        return 4096, True
    # v5e / v5p / unknown: stay inside the 16 MiB scoped-VMEM default.
    return 2048, False


def _make_kernel(mask_dtype):
    store_bool = mask_dtype == jnp.bool_

    def kernel(x_ref, add_ref, sub_ref, mul_ref, div_ref, gt_ref, lt_ref, eq_ref):
        x = x_ref[...]
        add_ref[...] = x + 2.0
        sub_ref[...] = x - 2.0
        mul_ref[...] = x * 2.0
        div_ref[...] = x * 0.5          # exact for /2
        gt = x > 1.0
        lt = x < 1.0
        eq = x == 1.0
        if not store_bool:
            gt = gt.astype(mask_dtype)
            lt = lt.astype(mask_dtype)
            eq = eq.astype(mask_dtype)
        gt_ref[...] = gt
        lt_ref[...] = lt
        eq_ref[...] = eq

    return kernel


def _build_call(rows, tile_r, num_tiles, dtype, mask_dtype):
    float_shape = jax.ShapeDtypeStruct((rows, _LANE), dtype)
    mask_shape = jax.ShapeDtypeStruct((rows, _LANE), mask_dtype)
    block = pl.BlockSpec((tile_r, _LANE), lambda i: (i, 0))
    n = rows * _LANE
    cost = pl.CostEstimate(
        flops=7 * n,
        transcendentals=0,
        bytes_accessed=4 * n + 4 * 4 * n + 3 * n,  # ~23 B/elem, memory-bound
    )
    return pl.pallas_call(
        _make_kernel(mask_dtype),
        out_shape=(float_shape,) * 4 + (mask_shape,) * 3,
        grid_spec=pl.GridSpec(
            grid=(num_tiles,),
            in_specs=[block],
            out_specs=(block,) * 7,
        ),
        compiler_params=pltpu.CompilerParams(
            dimension_semantics=("parallel",)),
        cost_estimate=cost,
    )


# Decided lazily at the first call: jnp.bool_ if Mosaic accepts direct bool
# stores (preferred, avoids an extra convert pass), else jnp.uint8 fallback.
_MASK_DTYPE = None


def pt_module_forward(x):
    """x: float32 array of shape (B, C, H, W). Returns the 7 outputs of PtModule."""
    global _MASK_DTYPE
    orig_shape = x.shape
    n_elems = x.size

    # Flatten to a lane-dense 2-D slab (rows, 128). Pad only if the element
    # count is not already a multiple of 128 (rare for NCHW conv shapes).
    rem = n_elems % _LANE
    pad = (_LANE - rem) % _LANE
    x_flat = x.reshape(-1)
    if pad:
        x_flat = jnp.pad(x_flat, (0, pad))
    rows = x_flat.size // _LANE
    x2d = x_flat.reshape(rows, _LANE)

    tile_cap, split_for_megacore = _pick_tiling()
    tile_r = rows if rows <= tile_cap else tile_cap
    if split_for_megacore and rows > _SUBLANE:
        # Ensure >= 2 grid steps so the "parallel" axis can span both TCs.
        half = -(-rows // 2)
        half = ((half + _SUBLANE - 1) // _SUBLANE) * _SUBLANE
        tile_r = min(tile_r, half)
    num_tiles = pl.cdiv(rows, tile_r)

    if _MASK_DTYPE is None:
        try:
            outs = _build_call(rows, tile_r, num_tiles, x.dtype, jnp.bool_)(x2d)
            outs = jax.block_until_ready(outs)
            _MASK_DTYPE = jnp.bool_
        except Exception:
            # Fallback: uint8 masks in-kernel, convert once in the wrapper.
            _MASK_DTYPE = jnp.uint8
            outs = _build_call(rows, tile_r, num_tiles, x.dtype, jnp.uint8)(x2d)
    else:
        outs = _build_call(rows, tile_r, num_tiles, x.dtype, _MASK_DTYPE)(x2d)

    masks_are_bool = _MASK_DTYPE is jnp.bool_

    def _restore(a, is_mask=False):
        a = a.reshape(-1)
        if pad:
            a = a[:n_elems]
        a = a.reshape(orig_shape)
        if is_mask and not masks_are_bool:
            a = a.astype(jnp.bool_)
        return a

    add_r, sub_r, mul_r, div_r, gt_r, lt_r, eq_r = outs
    return (_restore(add_r), _restore(sub_r), _restore(mul_r), _restore(div_r),
            _restore(gt_r, True), _restore(lt_r, True), _restore(eq_r, True))


if __name__ == "__main__":
    key = jax.random.PRNGKey(0)
    x = jax.random.normal(key, (2, 4, 16, 16), dtype=jnp.float32)

    outs = pt_module_forward(x)
    outs = jax.block_until_ready(outs)

    # reference check against plain jnp
    refs = (x + 2, x - 2, x * 2, x / 2, x > 1, x < 1, x == 1)
    for got, ref in zip(outs, refs):
        assert got.shape == ref.shape and got.dtype == ref.dtype
        if got.dtype == jnp.bool_:
            assert jnp.array_equal(got, ref)
        else:
            assert jnp.allclose(got, ref)

    print("KERNEL_OK")
</pallas_src>

<mosaic_0001>
module attributes {stable_mosaic.version = 11 : i64} {
  func.func @kernel(%arg0: i32, %arg1: memref<16x128xf32, #tpu.memory_space<vmem>>, %arg2: memref<16x128xf32, #tpu.memory_space<vmem>>, %arg3: memref<16x128xf32, #tpu.memory_space<vmem>>, %arg4: memref<16x128xf32, #tpu.memory_space<vmem>>, %arg5: memref<16x128xf32, #tpu.memory_space<vmem>>, %arg6: memref<16x128xi32, #tpu.memory_space<vmem>>, %arg7: memref<16x128xi32, #tpu.memory_space<vmem>>, %arg8: memref<16x128xi32, #tpu.memory_space<vmem>>) attributes {dimension_semantics = [#tpu.dimension_semantics<parallel>], iteration_bounds = array<i64: 1>, scalar_prefetch = 0 : i64, scratch_operands = 0 : i64, tpu.core_type = #tpu.core_type<tc>, window_params = [{transform_indices = @transform_0, window_bounds = array<i64: 16, 128>}, {transform_indices = @transform_1, window_bounds = array<i64: 16, 128>}, {transform_indices = @transform_2, window_bounds = array<i64: 16, 128>}, {transform_indices = @transform_3, window_bounds = array<i64: 16, 128>}, {transform_indices = @transform_4, window_bounds = array<i64: 16, 128>}, {transform_indices = @transform_5, window_bounds = array<i64: 16, 128>}, {transform_indices = @transform_6, window_bounds = array<i64: 16, 128>}, {transform_indices = @transform_7, window_bounds = array<i64: 16, 128>}]} {
    %c0 = arith.constant 0 : index
    %c0_0 = arith.constant 0 : index
    %0 = vector.load %arg1[%c0, %c0_0] : memref<16x128xf32, #tpu.memory_space<vmem>>, vector<16x128xf32>
    %cst = arith.constant 2.000000e+00 : f32
    %1 = vector.broadcast %cst : f32 to vector<16x128xf32>
    %2 = arith.addf %0, %1 : vector<16x128xf32>
    %c0_1 = arith.constant 0 : index
    %c0_2 = arith.constant 0 : index
    %3 = vector.load %arg2[%c0_1, %c0_2] : memref<16x128xf32, #tpu.memory_space<vmem>>, vector<16x128xf32>
    tpu.vector_store %arg2[%c0_1, %c0_2], %2 {strides = array<i32>} : memref<16x128xf32, #tpu.memory_space<vmem>>, vector<16x128xf32>,
    %cst_3 = arith.constant 2.000000e+00 : f32
    %4 = vector.broadcast %cst_3 : f32 to vector<16x128xf32>
    %5 = arith.subf %0, %4 : vector<16x128xf32>
    %c0_4 = arith.constant 0 : index
    %c0_5 = arith.constant 0 : index
    %6 = vector.load %arg3[%c0_4, %c0_5] : memref<16x128xf32, #tpu.memory_space<vmem>>, vector<16x128xf32>
    tpu.vector_store %arg3[%c0_4, %c0_5], %5 {strides = array<i32>} : memref<16x128xf32, #tpu.memory_space<vmem>>, vector<16x128xf32>,
    %cst_6 = arith.constant 2.000000e+00 : f32
    %7 = vector.broadcast %cst_6 : f32 to vector<16x128xf32>
    %8 = arith.mulf %0, %7 : vector<16x128xf32>
    %c0_7 = arith.constant 0 : index
    %c0_8 = arith.constant 0 : index
    %9 = vector.load %arg4[%c0_7, %c0_8] : memref<16x128xf32, #tpu.memory_space<vmem>>, vector<16x128xf32>
    tpu.vector_store %arg4[%c0_7, %c0_8], %8 {strides = array<i32>} : memref<16x128xf32, #tpu.memory_space<vmem>>, vector<16x128xf32>,
    %cst_9 = arith.constant 5.000000e-01 : f32
    %10 = vector.broadcast %cst_9 : f32 to vector<16x128xf32>
    %11 = arith.mulf %0, %10 : vector<16x128xf32>
    %c0_10 = arith.constant 0 : index
    %c0_11 = arith.constant 0 : index
    %12 = vector.load %arg5[%c0_10, %c0_11] : memref<16x128xf32, #tpu.memory_space<vmem>>, vector<16x128xf32>
    tpu.vector_store %arg5[%c0_10, %c0_11], %11 {strides = array<i32>} : memref<16x128xf32, #tpu.memory_space<vmem>>, vector<16x128xf32>,
    %cst_12 = arith.constant 1.000000e+00 : f32
    %13 = vector.broadcast %cst_12 : f32 to vector<16x128xf32>
    %14 = arith.cmpf ogt, %0, %13 : vector<16x128xf32>
    %cst_13 = arith.constant 1.000000e+00 : f32
    %15 = vector.broadcast %cst_13 : f32 to vector<16x128xf32>
    %16 = arith.cmpf olt, %0, %15 : vector<16x128xf32>
    %cst_14 = arith.constant 1.000000e+00 : f32
    %17 = vector.broadcast %cst_14 : f32 to vector<16x128xf32>
    %18 = arith.cmpf oeq, %0, %17 : vector<16x128xf32>
    %c0_15 = arith.constant 0 : index
    %c0_16 = arith.constant 0 : index
    %19 = vector.load %arg6[%c0_15, %c0_16] : memref<16x128xi32, #tpu.memory_space<vmem>>, vector<16x128xi32>
    %20 = arith.extui %14 : vector<16x128xi1> to vector<16x128xi32>
    %cst_17 = arith.constant dense<0> : vector<16x128xi32>
    %21 = arith.cmpi ne, %19, %cst_17 : vector<16x128xi32>
    tpu.vector_store %arg6[%c0_15, %c0_16], %20 {strides = array<i32>} : memref<16x128xi32, #tpu.memory_space<vmem>>, vector<16x128xi32>,
    %c0_18 = arith.constant 0 : index
    %c0_19 = arith.constant 0 : index
    %22 = vector.load %arg7[%c0_18, %c0_19] : memref<16x128xi32, #tpu.memory_space<vmem>>, vector<16x128xi32>
    %23 = arith.extui %16 : vector<16x128xi1> to vector<16x128xi32>
    %cst_20 = arith.constant dense<0> : vector<16x128xi32>
    %24 = arith.cmpi ne, %22, %cst_20 : vector<16x128xi32>
    tpu.vector_store %arg7[%c0_18, %c0_19], %23 {strides = array<i32>} : memref<16x128xi32, #tpu.memory_space<vmem>>, vector<16x128xi32>,
    %c0_21 = arith.constant 0 : index
    %c0_22 = arith.constant 0 : index
    %25 = vector.load %arg8[%c0_21, %c0_22] : memref<16x128xi32, #tpu.memory_space<vmem>>, vector<16x128xi32>
    %26 = arith.extui %18 : vector<16x128xi1> to vector<16x128xi32>
    %cst_23 = arith.constant dense<0> : vector<16x128xi32>
    %27 = arith.cmpi ne, %25, %cst_23 : vector<16x128xi32>
    tpu.vector_store %arg8[%c0_21, %c0_22], %26 {strides = array<i32>} : memref<16x128xi32, #tpu.memory_space<vmem>>, vector<16x128xi32>,
    return
  }
  func.func @transform_0(%arg0: i32) -> (i32, i32) {
    %c0_i32 = arith.constant 0 : i32
    %c0_i32_0 = arith.constant 0 : i32
    return %arg0, %c0_i32 : i32, i32
  }
  func.func @transform_1(%arg0: i32) -> (i32, i32) {
    %c0_i32 = arith.constant 0 : i32
    %c0_i32_0 = arith.constant 0 : i32
    return %arg0, %c0_i32 : i32, i32
  }
  func.func @transform_2(%arg0: i32) -> (i32, i32) {
    %c0_i32 = arith.constant 0 : i32
    %c0_i32_0 = arith.constant 0 : i32
    return %arg0, %c0_i32 : i32, i32
  }
  func.func @transform_3(%arg0: i32) -> (i32, i32) {
    %c0_i32 = arith.constant 0 : i32
    %c0_i32_0 = arith.constant 0 : i32
    return %arg0, %c0_i32 : i32, i32
  }
  func.func @transform_4(%arg0: i32) -> (i32, i32) {
    %c0_i32 = arith.constant 0 : i32
    %c0_i32_0 = arith.constant 0 : i32
    return %arg0, %c0_i32 : i32, i32
  }
  func.func @transform_5(%arg0: i32) -> (i32, i32) {
    %c0_i32 = arith.constant 0 : i32
    %c0_i32_0 = arith.constant 0 : i32
    return %arg0, %c0_i32 : i32, i32
  }
  func.func @transform_6(%arg0: i32) -> (i32, i32) {
    %c0_i32 = arith.constant 0 : i32
    %c0_i32_0 = arith.constant 0 : i32
    return %arg0, %c0_i32 : i32, i32
  }
  func.func @transform_7(%arg0: i32) -> (i32, i32) {
    %c0_i32 = arith.constant 0 : i32
    %c0_i32_0 = arith.constant 0 : i32
    return %arg0, %c0_i32 : i32, i32
  }
}

module attributes {stable_mosaic.version = 11 : i64} {
  func.func @kernel(%arg0: i32, %arg1: memref<16x128xf32, #tpu.memory_space<vmem>>, %arg2: memref<16x128xf32, #tpu.memory_space<vmem>>, %arg3: memref<16x128xf32, #tpu.memory_space<vmem>>, %arg4: memref<16x128xf32, #tpu.memory_space<vmem>>, %arg5: memref<16x128xf32, #tpu.memory_space<vmem>>, %arg6: memref<16x128xi8, #tpu.memory_space<vmem>>, %arg7: memref<16x128xi8, #tpu.memory_space<vmem>>, %arg8: memref<16x128xi8, #tpu.memory_space<vmem>>) attributes {dimension_semantics = [#tpu.dimension_semantics<parallel>], iteration_bounds = array<i64: 1>, scalar_prefetch = 0 : i64, scratch_operands = 0 : i64, tpu.core_type = #tpu.core_type<tc>, window_params = [{transform_indices = @transform_0, window_bounds = array<i64: 16, 128>}, {transform_indices = @transform_1, window_bounds = array<i64: 16, 128>}, {transform_indices = @transform_2, window_bounds = array<i64: 16, 128>}, {transform_indices = @transform_3, window_bounds = array<i64: 16, 128>}, {transform_indices = @transform_4, window_bounds = array<i64: 16, 128>}, {transform_indices = @transform_5, window_bounds = array<i64: 16, 128>}, {transform_indices = @transform_6, window_bounds = array<i64: 16, 128>}, {transform_indices = @transform_7, window_bounds = array<i64: 16, 128>}]} {
    %c0 = arith.constant 0 : index
    %c0_0 = arith.constant 0 : index
    %0 = vector.load %arg1[%c0, %c0_0] : memref<16x128xf32, #tpu.memory_space<vmem>>, vector<16x128xf32>
    %cst = arith.constant 2.000000e+00 : f32
    %1 = vector.broadcast %cst : f32 to vector<16x128xf32>
    %2 = arith.addf %0, %1 : vector<16x128xf32>
    %c0_1 = arith.constant 0 : index
    %c0_2 = arith.constant 0 : index
    %3 = vector.load %arg2[%c0_1, %c0_2] : memref<16x128xf32, #tpu.memory_space<vmem>>, vector<16x128xf32>
    tpu.vector_store %arg2[%c0_1, %c0_2], %2 {strides = array<i32>} : memref<16x128xf32, #tpu.memory_space<vmem>>, vector<16x128xf32>,
    %cst_3 = arith.constant 2.000000e+00 : f32
    %4 = vector.broadcast %cst_3 : f32 to vector<16x128xf32>
    %5 = arith.subf %0, %4 : vector<16x128xf32>
    %c0_4 = arith.constant 0 : index
    %c0_5 = arith.constant 0 : index
    %6 = vector.load %arg3[%c0_4, %c0_5] : memref<16x128xf32, #tpu.memory_space<vmem>>, vector<16x128xf32>
    tpu.vector_store %arg3[%c0_4, %c0_5], %5 {strides = array<i32>} : memref<16x128xf32, #tpu.memory_space<vmem>>, vector<16x128xf32>,
    %cst_6 = arith.constant 2.000000e+00 : f32
    %7 = vector.broadcast %cst_6 : f32 to vector<16x128xf32>
    %8 = arith.mulf %0, %7 : vector<16x128xf32>
    %c0_7 = arith.constant 0 : index
    %c0_8 = arith.constant 0 : index
    %9 = vector.load %arg4[%c0_7, %c0_8] : memref<16x128xf32, #tpu.memory_space<vmem>>, vector<16x128xf32>
    tpu.vector_store %arg4[%c0_7, %c0_8], %8 {strides = array<i32>} : memref<16x128xf32, #tpu.memory_space<vmem>>, vector<16x128xf32>,
    %cst_9 = arith.constant 5.000000e-01 : f32
    %10 = vector.broadcast %cst_9 : f32 to vector<16x128xf32>
    %11 = arith.mulf %0, %10 : vector<16x128xf32>
    %c0_10 = arith.constant 0 : index
    %c0_11 = arith.constant 0 : index
    %12 = vector.load %arg5[%c0_10, %c0_11] : memref<16x128xf32, #tpu.memory_space<vmem>>, vector<16x128xf32>
    tpu.vector_store %arg5[%c0_10, %c0_11], %11 {strides = array<i32>} : memref<16x128xf32, #tpu.memory_space<vmem>>, vector<16x128xf32>,
    %cst_12 = arith.constant 1.000000e+00 : f32
    %13 = vector.broadcast %cst_12 : f32 to vector<16x128xf32>
    %14 = arith.cmpf ogt, %0, %13 : vector<16x128xf32>
    %cst_13 = arith.constant 1.000000e+00 : f32
    %15 = vector.broadcast %cst_13 : f32 to vector<16x128xf32>
    %16 = arith.cmpf olt, %0, %15 : vector<16x128xf32>
    %cst_14 = arith.constant 1.000000e+00 : f32
    %17 = vector.broadcast %cst_14 : f32 to vector<16x128xf32>
    %18 = arith.cmpf oeq, %0, %17 : vector<16x128xf32>
    %19 = arith.extui %14 : vector<16x128xi1> to vector<16x128xi8>
    %20 = arith.extui %16 : vector<16x128xi1> to vector<16x128xi8>
    %21 = arith.extui %18 : vector<16x128xi1> to vector<16x128xi8>
    %c0_15 = arith.constant 0 : index
    %c0_16 = arith.constant 0 : index
    %22 = vector.load %arg6[%c0_15, %c0_16] : memref<16x128xi8, #tpu.memory_space<vmem>>, vector<16x128xi8>
    tpu.vector_store %arg6[%c0_15, %c0_16], %19 {strides = array<i32>} : memref<16x128xi8, #tpu.memory_space<vmem>>, vector<16x128xi8>,
    %c0_17 = arith.constant 0 : index
    %c0_18 = arith.constant 0 : index
    %23 = vector.load %arg7[%c0_17, %c0_18] : memref<16x128xi8, #tpu.memory_space<vmem>>, vector<16x128xi8>
    tpu.vector_store %arg7[%c0_17, %c0_18], %20 {strides = array<i32>} : memref<16x128xi8, #tpu.memory_space<vmem>>, vector<16x128xi8>,
    %c0_19 = arith.constant 0 : index
    %c0_20 = arith.constant 0 : index
    %24 = vector.load %arg8[%c0_19, %c0_20] : memref<16x128xi8, #tpu.memory_space<vmem>>, vector<16x128xi8>
    tpu.vector_store %arg8[%c0_19, %c0_20], %21 {strides = array<i32>} : memref<16x128xi8, #tpu.memory_space<vmem>>, vector<16x128xi8>,
    return
  }
  func.func @transform_0(%arg0: i32) -> (i32, i32) {
    %c0_i32 = arith.constant 0 : i32
    %c0_i32_0 = arith.constant 0 : i32
    return %arg0, %c0_i32 : i32, i32
  }
  func.func @transform_1(%arg0: i32) -> (i32, i32) {
    %c0_i32 = arith.constant 0 : i32
    %c0_i32_0 = arith.constant 0 : i32
    return %arg0, %c0_i32 : i32, i32
  }
  func.func @transform_2(%arg0: i32) -> (i32, i32) {
    %c0_i32 = arith.constant 0 : i32
    %c0_i32_0 = arith.constant 0 : i32
    return %arg0, %c0_i32 : i32, i32
  }
  func.func @transform_3(%arg0: i32) -> (i32, i32) {
    %c0_i32 = arith.constant 0 : i32
    %c0_i32_0 = arith.constant 0 : i32
    return %arg0, %c0_i32 : i32, i32
  }
  func.func @transform_4(%arg0: i32) -> (i32, i32) {
    %c0_i32 = arith.constant 0 : i32
    %c0_i32_0 = arith.constant 0 : i32
    return %arg0, %c0_i32 : i32, i32
  }
  func.func @transform_5(%arg0: i32) -> (i32, i32) {
    %c0_i32 = arith.constant 0 : i32
    %c0_i32_0 = arith.constant 0 : i32
    return %arg0, %c0_i32 : i32, i32
  }
  func.func @transform_6(%arg0: i32) -> (i32, i32) {
    %c0_i32 = arith.constant 0 : i32
    %c0_i32_0 = arith.constant 0 : i32
    return %arg0, %c0_i32 : i32, i32
  }
  func.func @transform_7(%arg0: i32) -> (i32, i32) {
    %c0_i32 = arith.constant 0 : i32
    %c0_i32_0 = arith.constant 0 : i32
    return %arg0, %c0_i32 : i32, i32
  }
}

</mosaic_0001>

<bundles_post_ra>
// kernel: tpu_custom_call.1
= control target key start
LH: loop header
LB: loop body
LE: loop exit
PB: predicated region body
PF: predicated region fallthrough
CT: control target
= control target key end

     0   :  { %13 = vsyncpa [#allocation3], 0  ;;  %s390_s0 = inlined_call_operand.hbm [shape: f32[16,128], index: 0, kind: input, shape index: {}]   ;;  %s391_s1 = inlined_call_operand.hbm [shape: f32[16,128], index: 1, kind: output, shape index: {0}]   ;;  %s392_s2 = inlined_call_operand.hbm [shape: f32[16,128], index: 2, kind: output, shape index: {1}]   ;;  %s393_s3 = inlined_call_operand.hbm [shape: f32[16,128], index: 3, kind: output, shape index: {2}]   ;;  %s394_s4 = inlined_call_operand.hbm [shape: f32[16,128], index: 4, kind: output, shape index: {3}]   ;;  %s395_s5 = inlined_call_operand.vmem [shape: s32[16,128], index: 5, kind: output, shape index: {4}]   ;;  %s396_s6 = inlined_call_operand.vmem [shape: s32[16,128], index: 6, kind: output, shape index: {5}]   ;;  %s397_s7 = inlined_call_operand.vmem [shape: s32[16,128], index: 7, kind: output, shape index: {6}]  }
   0x1   :  { %14 = vsyncpa [#allocation4], 0 }
   0x2   :  { %15 = vsyncpa [#allocation7], 0 }
   0x3   :  { %16 = vsyncpa [#allocation10], 0  ;;  %s262_s24 = smov [#allocation2]  }
   0x4   :  { %s22_s25 = sshll.u32 %s262_s24, 4  ;;  %s23_s25 = int_to_ptr.vmem [resolvable:$true] %s22_s25 }
   0x5   :  { %s162_s26 = scalar_lea.vmem %s23_s25, 256  ;;  %p167_p1 = scmp.lt.s32.totalorder %s23_s25, %s23_s25 }
   0x6   :  { %p163_p0 = scmp.ne.s32.totalorder %s23_s25, %s162_s26  ;;  %p168_p2 = scmp.lt.s32.totalorder %s162_s26, %s162_s26 }
   0x8   :  { %p169_p3 = por %p168_p2, %p167_p1 }
   0xa   :  { %p170_p4 = pnand %p169_p3, %p163_p0 }
   0xc   :  { %173 = shalt.err (!%p170_p4)
}
   0xd   :  { %s263_s27 = smov 128   ;;  %s264_s28 = smov 8  }
   0xe   :  { %28 = dma.hbm_to_vmem [thread:$0]  %s390_s0, 256, %s23_s25, [#allocation3], %s263_s27, %s263_s27, %s264_s28  }
   0xf   :  { %254 = dma.done.wait [#allocation3], 256  }
  0x10   :  { %255 = vsyncadd [#allocation3], 4294967040  ;;  %s265_s8 = smov [#allocation6]   ;;  %s266_s10 = smov [#allocation5]   ;;  %v32_v0 = vld [vmem:[#allocation2] sm:$0xff]  ;;  %v33_v1 = vld [vmem:[#allocation2 + $0x8] sm:$0xff] }
  0x11   :  { %s85_s9 = sshll.u32 %s265_s8, 4  ;;  %s73_s11 = sshll.u32 %s266_s10, 4  ;;  %v144_v2 = vadd.f32 -2.0, %v32_v0  ;;  %v145_v3 = vadd.f32 -2.0, %v33_v1  ;;  %v34_v4 = vadd.f32 2.0, %v32_v0  ;;  %v35_v5 = vadd.f32 2.0, %v33_v1  ;;  %s316_s9 = int_to_ptr.vmem [resolvable:$true] %s85_s9  ;;  %s318_s11 = int_to_ptr.vmem [resolvable:$true] %s73_s11 }
  0x12   :  { %s267_s12 = smov [#allocation8]   ;;  %s268_s14 = smov [#allocation9]   ;;  %v42_v6 = vmul.f32 2.0, %v32_v0  ;;  %v43_v7 = vmul.f32 2.0, %v33_v1  ;;  %v46_v8 = vmul.f32 0.5, %v32_v0  ;;  %v47_v9 = vmul.f32 0.5, %v33_v1 }
  0x13   :  { %s97_s13 = sshll.u32 %s267_s12, 4  ;;  %s109_s15 = sshll.u32 %s268_s14, 4  ;;  %40 = vst [vmem:[#allocation6] sm:$0xff] %v144_v2  ;;  %41 = vst [vmem:[#allocation6 + $0x8] sm:$0xff] %v145_v3  ;;  %vm50_vm0 = vcmp.gt.f32.partialorder %v32_v0, 1.0  ;;  %vm51_vm1 = vcmp.gt.f32.partialorder %v33_v1, 1.0  ;;  %s320_s13 = int_to_ptr.vmem [resolvable:$true] %s97_s13  ;;  %s322_s15 = int_to_ptr.vmem [resolvable:$true] %s109_s15 }
  0x14   :  { %36 = vst [vmem:[#allocation5] sm:$0xff] %v34_v4  ;;  %37 = vst [vmem:[#allocation5 + $0x8] sm:$0xff] %v35_v5  ;;  %vm52_vm2 = vcmp.lt.f32.partialorder %v32_v0, 1.0  ;;  %vm53_vm3 = vcmp.lt.f32.partialorder %v33_v1, 1.0  ;;  %s174_s0 = scalar_lea.vmem %s316_s9, 256  ;;  %p179_p6 = scmp.lt.s32.totalorder %s316_s9, %s316_s9 }
  0x15   :  { %44 = vst [vmem:[#allocation8] sm:$0xff] %v42_v6  ;;  %45 = vst [vmem:[#allocation8 + $0x8] sm:$0xff] %v43_v7  ;;  %p175_p5 = scmp.ne.s32.totalorder %s316_s9, %s174_s0  ;;  %p180_p7 = scmp.lt.s32.totalorder %s174_s0, %s174_s0 }
  0x16   :  { %48 = vst [vmem:[#allocation9] sm:$0xff] %v46_v8  ;;  %49 = vst [vmem:[#allocation9 + $0x8] sm:$0xff] %v47_v9 }
  0x17   :  { %p181_p8 = por %p180_p7, %p179_p6 }
  0x19   :  { %p182_p9 = pnand %p181_p8, %p175_p5 }
  0x1b   :  { %185 = shalt.err (!%p182_p9)
}
  0x1c   :  { %91 = dma.vmem_to_hbm [thread:$0]  %s316_s9, 256, %s392_s2, [#allocation7], %s263_s27, %s263_s27, %s264_s28   ;;  %v269_v10 = vmov 0   ;;  %vm54_vm4 = vcmp.eq.f32.partialorder %v32_v0, 1.0  ;;  %vm55_vm5 = vcmp.eq.f32.partialorder %v33_v1, 1.0 }
  0x1d   :  { %v56_v11 = vsel %vm50_vm0, 1, %v269_v10  ;;  %v57_v12 = vsel %vm51_vm1, 1, %v269_v10  ;;  %v60_v13 = vsel %vm52_vm2, 1, %v269_v10  ;;  %v61_v14 = vsel %vm53_vm3, 1, %v269_v10  ;;  %s194_s25 = scalar_lea.vmem %s318_s11, 256  ;;  %p199_p11 = scmp.lt.s32.totalorder %s318_s11, %s318_s11 }
  0x1e   :  { %58 = vst [vmem:[%s395_s5] sm:$0xff] %v56_v11  ;;  %59 = vst [vmem:[%s395_s5 + $0x8] sm:$0xff] %v57_v12  ;;  %p195_p10 = scmp.ne.s32.totalorder %s318_s11, %s194_s25  ;;  %p200_p12 = scmp.lt.s32.totalorder %s194_s25, %s194_s25 }
  0x1f   :  { %62 = vst [vmem:[%s396_s6] sm:$0xff] %v60_v13  ;;  %63 = vst [vmem:[%s396_s6 + $0x8] sm:$0xff] %v61_v14 }
  0x20   :  { %p201_p13 = por %p200_p12, %p199_p11 }
  0x22   :  { %p202_p0 = pnand %p201_p13, %p195_p10 }
  0x24   :  { %205 = shalt.err (!%p202_p0)
}
  0x25   :  { %79 = dma.vmem_to_hbm [thread:$0]  %s318_s11, 256, %s391_s1, [#allocation4], %s263_s27, %s263_s27, %s264_s28   ;;  %v64_v15 = vsel %vm54_vm4, 1, %v269_v10  ;;  %v65_v16 = vsel %vm55_vm5, 1, %v269_v10 }
  0x26   :  { %s214_s6 = scalar_lea.vmem %s320_s13, 256  ;;  %p219_p2 = scmp.lt.s32.totalorder %s320_s13, %s320_s13 }
  0x27   :  { %p215_p1 = scmp.ne.s32.totalorder %s320_s13, %s214_s6  ;;  %p220_p3 = scmp.lt.s32.totalorder %s214_s6, %s214_s6 }
  0x29   :  { %p221_p4 = por %p220_p3, %p219_p2 }
  0x2b   :  { %p222_p5 = pnand %p221_p4, %p215_p1 }
  0x2d   :  { %225 = shalt.err (!%p222_p5)
}
  0x2e   :  { %103 = dma.vmem_to_hbm [thread:$0]  %s320_s13, 256, %s393_s3, [#allocation7], %s263_s27, %s263_s27, %s264_s28  }
  0x2f   :  { %66 = vst [vmem:[%s397_s7] sm:$0xff] %v64_v15  ;;  %67 = vst [vmem:[%s397_s7 + $0x8] sm:$0xff] %v65_v16  ;;  %s234_s11 = scalar_lea.vmem %s322_s15, 256  ;;  %p239_p7 = scmp.lt.s32.totalorder %s322_s15, %s322_s15 }
  0x30   :  { %p235_p6 = scmp.ne.s32.totalorder %s322_s15, %s234_s11  ;;  %p240_p8 = scmp.lt.s32.totalorder %s234_s11, %s234_s11 }
  0x32   :  { %p241_p9 = por %p240_p8, %p239_p7 }
  0x34   :  { %p242_p10 = pnand %p241_p9, %p235_p6 }
  0x36   :  { %245 = shalt.err (!%p242_p10)
}
  0x37   :  { %115 = dma.vmem_to_hbm [thread:$0]  %s322_s15, 256, %s394_s4, [#allocation10], %s263_s27, %s263_s27, %s264_s28  }
  0x38   :  { %256 = dma.done.wait [#allocation4], 256  }
  0x39   :  { %257 = vsyncadd [#allocation4], 4294967040 }
  0x3a   :  { %258 = dma.done.wait [#allocation7], 512  }
  0x3b   :  { %259 = vsyncadd [#allocation7], 4294966784 }
  0x3c   :  { %260 = dma.done.wait [#allocation10], 256  }
  0x3d   :  { %261 = vsyncadd [#allocation10], 4294967040 }
  0x3e   :  { %140 = vsyncpa [#allocation3], 1 }
  0x3f   :  { %141 = vsyncpa [#allocation4], 1 }
  0x40   :  { %142 = vsyncpa [#allocation7], 1 }
  0x41   :  { %143 = vsyncpa [#allocation10], 1 }

// kernel: tpu_custom_call.1
= control target key start
LH: loop header
LB: loop body
LE: loop exit
PB: predicated region body
PF: predicated region fallthrough
CT: control target
= control target key end

     0   :  { %13 = vsyncpa [#allocation3], 0  ;;  %s550_s0 = inlined_call_operand.hbm [shape: f32[16,128], index: 0, kind: input, shape index: {}]   ;;  %s551_s1 = inlined_call_operand.hbm [shape: f32[16,128], index: 1, kind: output, shape index: {0}]   ;;  %s552_s2 = inlined_call_operand.hbm [shape: f32[16,128], index: 2, kind: output, shape index: {1}]   ;;  %s553_s3 = inlined_call_operand.hbm [shape: f32[16,128], index: 3, kind: output, shape index: {2}]   ;;  %s554_s4 = inlined_call_operand.hbm [shape: f32[16,128], index: 4, kind: output, shape index: {3}]   ;;  %s555_s5 = inlined_call_operand.hbm [shape: u8[16,128], index: 5, kind: output, shape index: {4}]   ;;  %s556_s6 = inlined_call_operand.hbm [shape: u8[16,128], index: 6, kind: output, shape index: {5}]   ;;  %s557_s7 = inlined_call_operand.hbm [shape: u8[16,128], index: 7, kind: output, shape index: {6}]  }
   0x1   :  { %14 = vsyncpa [#allocation4], 0 }
   0x2   :  { %15 = vsyncpa [#allocation7], 0 }
   0x3   :  { %16 = vsyncpa [#allocation10], 0 }
   0x4   :  { %17 = vsyncpa [#allocation13], 0  ;;  %s387_s24 = smov [#allocation2]  }
   0x5   :  { %s23_s25 = sshll.u32 %s387_s24, 4  ;;  %s24_s25 = int_to_ptr.vmem [resolvable:$true] %s23_s25 }
   0x6   :  { %s225_s26 = scalar_lea.vmem %s24_s25, 256  ;;  %p230_p1 = scmp.lt.s32.totalorder %s24_s25, %s24_s25 }
   0x7   :  { %p226_p0 = scmp.ne.s32.totalorder %s24_s25, %s225_s26  ;;  %p231_p2 = scmp.lt.s32.totalorder %s225_s26, %s225_s26 }
   0x9   :  { %p232_p3 = por %p231_p2, %p230_p1 }
   0xb   :  { %p233_p4 = pnand %p232_p3, %p226_p0 }
   0xd   :  { %236 = shalt.err (!%p233_p4)
}
   0xe   :  { %s388_s27 = smov 128   ;;  %s389_s28 = smov 8  }
   0xf   :  { %29 = dma.hbm_to_vmem [thread:$0]  %s550_s0, 256, %s24_s25, [#allocation3], %s388_s27, %s388_s27, %s389_s28  }
  0x10   :  { %377 = dma.done.wait [#allocation3], 256  }
  0x11   :  { %378 = vsyncadd [#allocation3], 4294967040  ;;  %s390_s8 = smov [#allocation6]   ;;  %s391_s10 = smov [#allocation9]   ;;  %v446_v0 = vld [vmem:[#allocation2] sm:$0xff]  ;;  %v448_v1 = vld [vmem:[#allocation2 + $0x8] sm:$0xff] }
  0x12   :  { %s109_s9 = sshll.u32 %s390_s8, 4  ;;  %s133_s11 = sshll.u32 %s391_s10, 4  ;;  %v202_v2 = vadd.f32 -2.0, %v446_v0  ;;  %v203_v3 = vadd.f32 -2.0, %v448_v1  ;;  %v49_v4 = vmul.f32 0.5, %v446_v0  ;;  %v50_v5 = vmul.f32 0.5, %v448_v1  ;;  %s450_s9 = int_to_ptr.vmem [resolvable:$true] %s109_s9  ;;  %s456_s11 = int_to_ptr.vmem [resolvable:$true] %s133_s11 }
  0x13   :  { %s392_s12 = smov [#allocation5]   ;;  %s393_s0 = smov [#allocation8]   ;;  %vm55_vm0 = vcmp.lt.f32.partialorder %v446_v0, 1.0  ;;  %vm56_vm1 = vcmp.lt.f32.partialorder %v448_v1, 1.0  ;;  %v37_v6 = vadd.f32 2.0, %v446_v0  ;;  %v38_v7 = vadd.f32 2.0, %v448_v1 }
  0x14   :  { %s97_s13 = sshll.u32 %s392_s12, 4  ;;  %s121_s14 = sshll.u32 %s393_s0, 4  ;;  %43 = vst [vmem:[#allocation6] sm:$0xff] %v202_v2  ;;  %44 = vst [vmem:[#allocation6 + $0x8] sm:$0xff] %v203_v3  ;;  %v45_v9 = vmul.f32 2.0, %v446_v0  ;;  %v46_v10 = vmul.f32 2.0, %v448_v1  ;;  %s464_s13 = int_to_ptr.vmem [resolvable:$true] %s97_s13  ;;  %s474_s14 = int_to_ptr.vmem [resolvable:$true] %s121_s14 }
  0x15   :  { %s394_s15 = smov [#allocation12]   ;;  %51 = vst [vmem:[#allocation9] sm:$0xff] %v49_v4  ;;  %52 = vst [vmem:[#allocation9 + $0x8] sm:$0xff] %v50_v5  ;;  %vm53_vm3 = vcmp.gt.f32.partialorder %v446_v0, 1.0  ;;  %vm54_vm4 = vcmp.gt.f32.partialorder %v448_v1, 1.0  ;;  %vm57_vm6 = vcmp.eq.f32.partialorder %v446_v0, 1.0  ;;  %p242_p6 = scmp.lt.s32.totalorder %s450_s9, %s450_s9 }
  0x16   :  { %s462_s16 = sshll.u32 %s394_s15, 4  ;;  %vm466_vm2 = vmpackc.low %vm56_vm1, %vm55_vm0  ;;  %39 = vst [vmem:[#allocation5] sm:$0xff] %v37_v6  ;;  %vm58_vm7 = vcmp.eq.f32.partialorder %v448_v1, 1.0  ;;  %s237_s17 = scalar_lea.vmem %s450_s9, 256  ;;  %s158_s16 = int_to_ptr.vmem [resolvable:$true] %s462_s16 }
  0x17   :  { %vm63_vm5 = vmpackc.even %vm466_vm2, %vm466_vm2  ;;  %40 = vst [vmem:[#allocation5 + $0x8] sm:$0xff] %v38_v7  ;;  %p238_p5 = scmp.ne.s32.totalorder %s450_s9, %s237_s17  ;;  %p243_p7 = scmp.lt.s32.totalorder %s237_s17, %s237_s17 }
  0x19   :  { %p244_p8 = por %p243_p7, %p242_p6 }
  0x1b   :  { %p245_p9 = pnand %p244_p8, %p238_p5 }
  0x1d   :  { %248 = shalt.err (!%p245_p9)
}
  0x1e   :  { %115 = dma.vmem_to_hbm [thread:$0]  %s450_s9, 256, %s552_s2, [#allocation7], %s388_s27, %s388_s27, %s389_s28   ;;  %v395_v11 = vmov 0   ;;  %47 = vst [vmem:[#allocation8] sm:$0xff] %v45_v9  ;;  %48 = vst [vmem:[#allocation8 + $0x8] sm:$0xff] %v46_v10 }
  0x1f   :  { %v64_v12 = vsel %vm63_vm5, 16843009, %v395_v11  ;;  %vm496_vm8 = vmpackc.low %vm54_vm4, %vm53_vm3  ;;  %s257_s20 = scalar_lea.vmem %s456_s11, 256  ;;  %p262_p11 = scmp.lt.s32.totalorder %s456_s11, %s456_s11 }
  0x20   :  { %p258_p10 = scmp.ne.s32.totalorder %s456_s11, %s257_s20  ;;  %p263_p12 = scmp.lt.s32.totalorder %s257_s20, %s257_s20 }
  0x22   :  { %p264_p13 = por %p263_p12, %p262_p11 }
  0x24   :  { %p265_p0 = pnand %p264_p13, %p258_p10 }
  0x26   :  { %268 = shalt.err (!%p265_p0)
}
  0x27   :  { %139 = dma.vmem_to_hbm [thread:$0]  %s456_s11, 256, %s554_s4, [#allocation10], %s388_s27, %s388_s27, %s389_s28   ;;  %v76_v14 = vunpack.c.0.s8 %v64_v12  ;;  %v77_v15 = vunpack.c.1.s8 %v64_v12  ;;  %vm60_vm9 = vmpackc.even %vm496_vm8, %vm496_vm8 }
  0x28   :  { %s277_s22 = scalar_lea.vmem %s464_s13, 256  ;;  %p282_p2 = scmp.lt.s32.totalorder %s464_s13, %s464_s13 }
  0x29   :  { %p278_p1 = scmp.ne.s32.totalorder %s464_s13, %s277_s22  ;;  %p283_p3 = scmp.lt.s32.totalorder %s277_s22, %s277_s22 }
  0x2b   :  { %p284_p4 = por %p283_p3, %p282_p2 }
  0x2d   :  { %p285_p5 = pnand %p284_p4, %p278_p1 }
  0x2f   :  { %288 = shalt.err (!%p285_p5)
}
  0x30   :  { %103 = dma.vmem_to_hbm [thread:$0]  %s464_s13, 256, %s551_s1, [#allocation4], %s388_s27, %s388_s27, %s389_s28   ;;  %v61_v16 = vsel %vm60_vm9, 16843009, %v395_v11  ;;  %vm65_vm10 = vmpackc.low %vm58_vm7, %vm57_vm6 }
  0x31   :  { %s297_s4 = scalar_lea.vmem %s474_s14, 256  ;;  %p302_p7 = scmp.lt.s32.totalorder %s474_s14, %s474_s14 }
  0x32   :  { %p298_p6 = scmp.ne.s32.totalorder %s474_s14, %s297_s4  ;;  %p303_p8 = scmp.lt.s32.totalorder %s297_s4, %s297_s4 }
  0x34   :  { %p304_p9 = por %p303_p8, %p302_p7 }
  0x36   :  { %p305_p10 = pnand %p304_p9, %p298_p6 }
  0x38   :  { %308 = shalt.err (!%p305_p10)
}
  0x39   :  { %127 = dma.vmem_to_hbm [thread:$0]  %s474_s14, 256, %s553_s3, [#allocation7], %s388_s27, %s388_s27, %s389_s28   ;;  %v78_v17 = vpack.c.b16 %v76_v14, %v76_v14  ;;  %v80_v18 = vpack.c.b16 %v77_v15, %v77_v15  ;;  %v68_v19 = vunpack.c.0.s8 %v61_v16  ;;  %v69_v20 = vunpack.c.1.s8 %v61_v16  ;;  %vm66_vm11 = vmpackc.even %vm65_vm10, %vm65_vm10 }
  0x3a   :  { %v67_v21 = vsel %vm66_vm11, 16843009, %v395_v11  ;;  %s396_s1 = smov [#allocation11]   ;;  %s397_s30 = smov [#allocation14]  }
  0x3b   :  { %s145_s29 = sshll.u32 %s396_s1, 4  ;;  %v79_v22 = vpack.c.b8 %v78_v17, %v78_v17  ;;  %v81_v23 = vpack.c.b8 %v80_v18, %v80_v18  ;;  %v70_v24 = vpack.c.b16 %v68_v19, %v68_v19  ;;  %v72_v25 = vpack.c.b16 %v69_v20, %v69_v20  ;;  %s169_s8 = sshll.u32 %s397_s30, 4  ;;  %s146_s29 = int_to_ptr.vmem [resolvable:$true] %s145_s29  ;;  %s170_s8 = int_to_ptr.vmem [resolvable:$true] %s169_s8 }
  0x3c   :  { %v84_v26 = vunpack.c.0.s8 %v67_v21  ;;  %v85_v27 = vunpack.c.1.s8 %v67_v21  ;;  %s317_s3 = scalar_lea.vmem %s158_s16, 64  ;;  %p322_p12 = scmp.lt.s32.totalorder %s158_s16, %s158_s16 }
  0x3d   :  { %82 = vst [vmem:[#allocation12] sm:$0x3] %v79_v22  ;;  %83 = vst [vmem:[#allocation12 + $0x2] sm:$0x3] %v81_v23  ;;  %v71_v28 = vpack.c.b8 %v70_v24, %v70_v24  ;;  %v73_v29 = vpack.c.b8 %v72_v25, %v72_v25  ;;  %p318_p11 = scmp.ne.s32.totalorder %s158_s16, %s317_s3  ;;  %p323_p13 = scmp.lt.s32.totalorder %s317_s3, %s317_s3 }
  0x3e   :  { %v86_v30 = vpack.c.b16 %v84_v26, %v84_v26  ;;  %v88_v31 = vpack.c.b16 %v85_v27, %v85_v27 }
  0x3f   :  { %p324_p0 = por %p323_p13, %p322_p12 }
  0x41   :  { %p325_p1 = pnand %p324_p0, %p318_p11 }
  0x43   :  { %328 = shalt.err (!%p325_p1)
}
  0x44   :  { %s398_s27 = smov 32   ;;  %s399_s28 = smov 2   ;;  %74 = vst [vmem:[#allocation11] sm:$0x3] %v71_v28  ;;  %75 = vst [vmem:[#allocation11 + $0x2] sm:$0x3] %v73_v29  ;;  %v87_v32 = vpack.c.b8 %v86_v30, %v86_v30  ;;  %v89_v33 = vpack.c.b8 %v88_v31, %v88_v31 }
  0x45   :  { %163 = dma.vmem_to_hbm [thread:$0]  %s158_s16, 64, %s556_s6, [#allocation13], %s398_s27, %s398_s27, %s399_s28  }
  0x46   :  { %s337_s11 = scalar_lea.vmem %s146_s29, 64  ;;  %p342_p3 = scmp.lt.s32.totalorder %s146_s29, %s146_s29 }
  0x47   :  { %p338_p2 = scmp.ne.s32.totalorder %s146_s29, %s337_s11  ;;  %p343_p4 = scmp.lt.s32.totalorder %s337_s11, %s337_s11 }
  0x49   :  { %p344_p5 = por %p343_p4, %p342_p3 }
  0x4b   :  { %p345_p6 = pnand %p344_p5, %p338_p2 }
  0x4d   :  { %348 = shalt.err (!%p345_p6)
}
  0x4e   :  { %151 = dma.vmem_to_hbm [thread:$0]  %s146_s29, 64, %s555_s5, [#allocation10], %s398_s27, %s398_s27, %s399_s28   ;;  %90 = vst [vmem:[#allocation14] sm:$0x3] %v87_v32  ;;  %91 = vst [vmem:[#allocation14 + $0x2] sm:$0x3] %v89_v33 }
  0x4f   :  { %s357_s0 = scalar_lea.vmem %s170_s8, 64  ;;  %p362_p8 = scmp.lt.s32.totalorder %s170_s8, %s170_s8 }
  0x50   :  { %p358_p7 = scmp.ne.s32.totalorder %s170_s8, %s357_s0  ;;  %p363_p9 = scmp.lt.s32.totalorder %s357_s0, %s357_s0 }
  0x52   :  { %p364_p10 = por %p363_p9, %p362_p8 }
  0x54   :  { %p365_p11 = pnand %p364_p10, %p358_p7 }
  0x56   :  { %368 = shalt.err (!%p365_p11)
}
  0x57   :  { %175 = dma.vmem_to_hbm [thread:$0]  %s170_s8, 64, %s557_s7, [#allocation13], %s398_s27, %s398_s27, %s399_s28  }
  0x58   :  { %379 = dma.done.wait [#allocation4], 256  }
  0x59   :  { %380 = vsyncadd [#allocation4], 4294967040 }
  0x5a   :  { %381 = dma.done.wait [#allocation7], 512  }
  0x5b   :  { %382 = vsyncadd [#allocation7], 4294966784 }
  0x5c   :  { %383 = dma.done.wait [#allocation10], 320  }
  0x5d   :  { %384 = vsyncadd [#allocation10], 4294966976 }
  0x5e   :  { %385 = dma.done.wait [#allocation13], 128  }
  0x5f   :  { %386 = vsyncadd [#allocation13], 4294967168 }
  0x60   :  { %197 = vsyncpa [#allocation3], 1 }
  0x61   :  { %198 = vsyncpa [#allocation4], 1 }
  0x62   :  { %199 = vsyncpa [#allocation7], 1 }
  0x63   :  { %200 = vsyncpa [#allocation10], 1 }
  0x64   :  { %201 = vsyncpa [#allocation13], 1 }

</bundles_post_ra>
